<compile_context>
chip_gen: v5e
topology: v5e:2x2
jax: 0.10.0
libtpu: 0.0.40
codegen_flags: <defaults>
</compile_context>

<pallas_src>
import jax
import jax.numpy as jnp
from jax import lax
from jax.experimental import pallas as pl
from jax.experimental.pallas import tpu as pltpu

# ---- problem configuration: ObjectAttention(channel=16, kernel_size=3),
#      decoder_map (B,1,H,W), encoder_map (B,C,H,W) ----
B = 2
C = 16                 # ObjectAttention channel
H = W = 16
HW = H * W
K = 3                  # depthwise kernel size
C2 = C // 2            # 8  (DWSConv output channels)
C8 = C // 8            # 2  (per-branch BasicConv2d output channels)
EPS = 1e-5             # BatchNorm eps (PyTorch default); BN in eval mode
DENOISE = 0.93         # cfg.denoise

_SELU_ALPHA = 1.6732632423543772
_SELU_SCALE = 1.0507009873554805

# column layout of the packed per-row parameter array `colp` (B*C rows):
COL_DWS_TAP = 0                 # 9 cols: DWSConv depthwise taps (BN1-scaled)
COL_DWS_B = 9                   # BN1 bias
COL_B2 = 10                     # BN2 bias                (rows 0..B*C2-1)
COL_BR1_S = 11                  # branch-1 1x1 dw scale   (rows 0..B*C2-1)
COL_BR1_B = 12                  # branch-1 dw BN bias
COL_BR_TAP = (13, 23, 33)       # branch 2/3/4 taps (9 cols each)
COL_BR_B = (22, 32, 42)         # branch 2/3/4 dw BN biases
COL_BCAT = 43                   # branch 1x1-conv BN biases (concat layout)
COL_C1B = 44                    # conv1 BN bias (scalar, row 0)
NCOLS = 45


def _selu(x):
    return _SELU_SCALE * jnp.where(x > 0, x, _SELU_ALPHA * jnp.expm1(x))


def _fold_bn(bn):
    """Eval-mode BatchNorm -> (scale, bias)."""
    g, b, m, v = bn
    s = g * lax.rsqrt(v + EPS)
    return s, b - m * s


# ----------------------- one-time pltpu.roll direction probe -----------------------
_ROLL_MATCHES_JNP = None


def _detect_roll_convention():
    """Run once: pin down pltpu.roll's rotation direction so the static lane
    shifts used by the depthwise taps are correct on any convention."""
    global _ROLL_MATCHES_JNP
    if _ROLL_MATCHES_JNP is not None:
        return

    def probe(x_ref, o_ref):
        o_ref[...] = pltpu.roll(x_ref[...], 1, axis=1)

    x = jnp.tile(jnp.arange(128, dtype=jnp.float32)[None, :], (8, 1))
    out = pl.pallas_call(
        probe, out_shape=jax.ShapeDtypeStruct((8, 128), jnp.float32))(x)
    v = float(out[0, 0])
    if v == 127.0:
        _ROLL_MATCHES_JNP = True      # out[i] = x[i - shift]  (jnp.roll convention)
    elif v == 1.0:
        _ROLL_MATCHES_JNP = False     # out[i] = x[i + shift]
    else:
        raise RuntimeError(f"unexpected pltpu.roll probe value: {v}")


# --------------------------------- the kernel ---------------------------------
def _object_attention_kernel(dec_ref, enc_ref, colp_ref, wpw_ref, wbr_ref,
                             wc1_ref, bmask_ref, o_ref):
    f32 = jnp.float32

    if _ROLL_MATCHES_JNP is None:
        raise RuntimeError("prepare_params() must run before the kernel is traced")

    def shift(arr, delta):
        # out[..., i] = arr[..., (i + delta) % HW]; boundary lanes handled by masks.
        if delta == 0:
            return arr
        n = arr.shape[-1]
        s = (-delta) % n if _ROLL_MATCHES_JNP else delta % n
        return pltpu.roll(arr, s, axis=arr.ndim - 1)

    def mrow(idx):                       # (1, HW) boundary mask row
        return bmask_ref[idx:idx + 1, :]

    def col(base, c, nrows):             # (nrows, 1) per-row parameter column
        return colp_ref[0:nrows, base + c:base + c + 1]

    def dw3x3(arr, nrows, tap_col, d, d_idx):
        """3x3 depthwise conv, dilation d, 'same' padding, on (nrows, HW)."""
        acc = None
        for kw in range(K):
            dw = (kw - 1) * d
            xw = shift(arr, dw)
            if dw != 0:
                xw = xw * mrow(4 * d_idx + (0 if dw < 0 else 1))
            for kh in range(K):
                dh = (kh - 1) * d
                xs = shift(xw, dh * W)
                if dh != 0:
                    xs = xs * mrow(4 * d_idx + 2 + (0 if dh < 0 else 1))
                t = xs * col(tap_col, kh * K + kw, nrows)
                acc = t if acc is None else acc + t
        return acc

    # ---- object / background masking on the (B, HW) decoder rows ----
    dp = dec_ref[...]                                        # (B, HW)
    sig = 1.0 / (1.0 + jnp.exp(-dp))
    m = jnp.where(sig < (1.0 - DENOISE), sig, 1.0)           # == mask_ob + edge
    mfull = jnp.concatenate(
        [jnp.broadcast_to(m[b:b + 1, :], (C, HW)) for b in range(B)], axis=0)
    x = enc_ref[...] * mfull                                 # (B*C, HW)

    # ---- DWSConv: depthwise 3x3 (BN1 folded) + SELU, pointwise 1x1 (BN2 folded) + SELU ----
    y1 = _selu(dw3x3(x, B * C, COL_DWS_TAP, 1, 0) + col(COL_DWS_B, 0, B * C))
    y = _selu(jnp.dot(wpw_ref[...], y1, preferred_element_type=f32)
              + col(COL_B2, 0, B * C2))                      # (B*C2, HW) == skip

    # ---- branch 1: 1x1 depthwise (per-row affine, BN folded) + SELU;
    #      its 1x1-conv contribution goes straight into the accumulator ----
    u = _selu(y * col(COL_BR1_S, 0, B * C2) + col(COL_BR1_B, 0, B * C2))
    cat = jnp.dot(wbr_ref[0:B * C2, :], u, preferred_element_type=f32)

    # ---- branches 2..4: dilated 3x3 depthwise (d = 1, 3, 5), BN folded, SELU;
    #      accumulate the 1x1-conv outputs (disjoint block rows -> one SELU later) ----
    for i, d in enumerate((1, 3, 5)):
        u = _selu(dw3x3(y, B * C2, COL_BR_TAP[i], d, i) + col(COL_BR_B[i], 0, B * C2))
        cat = cat + jnp.dot(wbr_ref[(i + 1) * B * C2:(i + 2) * B * C2, :], u,
                            preferred_element_type=f32)

    xb = _selu(cat + col(COL_BCAT, 0, B * C2)) + y           # concat(1x1 outs) + skip

    # ---- conv1 (1x1 -> 1 channel, BN folded); relu(selu(t)) == scale*relu(t); + decoder ----
    pre = (jnp.dot(wc1_ref[...], xb, preferred_element_type=f32)
           + colp_ref[0:1, COL_C1B:COL_C1B + 1])
    o_ref[...] = _SELU_SCALE * jnp.maximum(pre, 0.0) + dp    # (B, HW)


# --------------------- run-once weight folding / packing ---------------------
def prepare_params(P):
    """Fold every eval-mode BatchNorm and pack weights for the kernel layout.
    Input-independent; call ONCE and reuse the result for every forward call."""
    _detect_roll_convention()
    f32 = jnp.float32
    eye_b = jnp.eye(B, dtype=f32)

    s1, b1 = _fold_bn(P["dws_bn1"])
    t1 = P["dws_dw_w"].reshape(C, K * K) * s1[:, None]            # (C, 9)

    s2, b2 = _fold_bn(P["dws_bn2"])
    pw_eff = P["dws_pw_w"].reshape(C2, C) * s2[:, None]           # (C2, C)
    wpw = jnp.kron(eye_b, pw_eff)                                 # (B*C2, B*C)

    sa1, ba1 = _fold_bn(P["br_dw_bn"][0])
    br1_s = P["br_dw_w"][0].reshape(C2) * sa1                     # (C2,)

    br_taps, br_bias = [], []
    for i in range(3):                                            # dilations 1, 3, 5
        sa, ba = _fold_bn(P["br_dw_bn"][i + 1])
        br_taps.append(P["br_dw_w"][i + 1].reshape(C2, K * K) * sa[:, None])
        br_bias.append(ba)

    wbr_blocks, bcat = [], []
    for j in range(4):
        sb, bb = _fold_bn(P["br_pw_bn"][j])
        wj = P["br_pw_w"][j].reshape(C8, C2) * sb[:, None]        # (C8, C2)
        ej = jnp.zeros((C2, C2), f32).at[j * C8:(j + 1) * C8, :].set(wj)
        wbr_blocks.append(jnp.kron(eye_b, ej))                    # (B*C2, B*C2)
        bcat.append(bb)
    wbr = jnp.concatenate(wbr_blocks, axis=0)                     # (4*B*C2, B*C2)
    bcat = jnp.tile(jnp.concatenate(bcat), (B,))                  # (B*C2,)

    sc, bc = _fold_bn(P["c1_bn"])
    w1_eff = P["c1_w"].reshape(C2) * sc                           # (C2,)
    wc1 = jnp.kron(eye_b, w1_eff[None, :])                        # (B, B*C2)

    # per-row column parameters (rows r = b*C + c  /  b*C2 + c)
    colp = jnp.zeros((B * C, NCOLS), f32)
    colp = colp.at[:, COL_DWS_TAP:COL_DWS_TAP + K * K].set(jnp.tile(t1, (B, 1)))
    colp = colp.at[:, COL_DWS_B].set(jnp.tile(b1, (B,)))
    colp = colp.at[0:B * C2, COL_B2].set(jnp.tile(b2, (B,)))
    colp = colp.at[0:B * C2, COL_BR1_S].set(jnp.tile(br1_s, (B,)))
    colp = colp.at[0:B * C2, COL_BR1_B].set(jnp.tile(ba1, (B,)))
    for i in range(3):
        colp = colp.at[0:B * C2, COL_BR_TAP[i]:COL_BR_TAP[i] + K * K].set(
            jnp.tile(br_taps[i], (B, 1)))
        colp = colp.at[0:B * C2, COL_BR_B[i]].set(jnp.tile(br_bias[i], (B,)))
    colp = colp.at[0:B * C2, COL_BCAT].set(bcat)
    colp = colp.at[0, COL_C1B].set(bc[0])

    # boundary masks for the rolled depthwise taps: rows per dilation d are
    # [valid(w-d), valid(w+d), valid(h-d), valid(h+d)] over the flattened H*W lanes
    hh = jnp.arange(HW, dtype=jnp.int32) // W
    ww = jnp.arange(HW, dtype=jnp.int32) % W
    rows = []
    for d in (1, 3, 5):
        rows += [ww >= d, ww < W - d, hh >= d, hh < H - d]
    bmask = jnp.stack(rows).astype(f32)                           # (12, HW)

    return dict(colp=colp, wpw=wpw, wbr=wbr, wc1=wc1, bmask=bmask)


# --------------------------------- wrapper ---------------------------------
@jax.jit
def object_attention_pallas(decoder_map, encoder_map, packed):
    """decoder_map: (B,1,H,W), encoder_map: (B,C,H,W) -> (B,1,H,W)."""
    dec = decoder_map.reshape(B, HW)            # free reshape
    enc = encoder_map.reshape(B * C, HW)        # free reshape (NCHW is channel-major)

    vmem = pl.BlockSpec(memory_space=pltpu.MemorySpace.VMEM)
    out = pl.pallas_call(
        _object_attention_kernel,
        out_shape=jax.ShapeDtypeStruct((B, HW), jnp.float32),
        in_specs=[vmem] * 7,
        out_specs=vmem,
    )(dec, enc, packed["colp"], packed["wpw"], packed["wbr"],
      packed["wc1"], packed["bmask"])

    return out.reshape(B, 1, H, W)


# ----------------------------- plain-JAX reference -----------------------------
def _conv(x, w, padding, dilation=1, groups=1):
    return lax.conv_general_dilated(
        x, w, window_strides=(1, 1),
        padding=((padding, padding), (padding, padding)),
        rhs_dilation=(dilation, dilation),
        dimension_numbers=("NCHW", "OIHW", "NCHW"),
        feature_group_count=groups,
        precision=lax.Precision.HIGHEST)


def _bn(x, bn):
    s, b = _fold_bn(bn)
    return x * s[None, :, None, None] + b[None, :, None, None]


def object_attention_reference(decoder_map, encoder_map, P):
    # BatchNorm is evaluated in eval mode (running stats), as in the kernel.
    sig = jax.nn.sigmoid(decoder_map)
    bg = 1.0 - sig
    edge = jnp.where(bg > DENOISE, 0.0, bg)
    x = sig * encoder_map + edge * encoder_map

    x = _selu(_bn(_conv(x, P["dws_dw_w"], 1, 1, groups=C), P["dws_bn1"]))
    x = _selu(_bn(_conv(x, P["dws_pw_w"], 0), P["dws_bn2"]))
    skip = x

    pads = (0, 1, 3, 5)
    dils = (1, 1, 3, 5)
    outs = []
    for i in range(4):
        u = _selu(_bn(_conv(x, P["br_dw_w"][i], pads[i], dils[i], groups=C2),
                      P["br_dw_bn"][i]))
        outs.append(_selu(_bn(_conv(u, P["br_pw_w"][i], 0), P["br_pw_bn"][i])))
    xx = jnp.concatenate(outs, axis=1) + skip

    out = jnp.maximum(_selu(_bn(_conv(xx, P["c1_w"], 0), P["c1_bn"])), 0.0)
    return out + decoder_map


if __name__ == "__main__":
    ks = list(jax.random.split(jax.random.PRNGKey(0), 32))

    def normal(k, shape, scale=0.2):
        return scale * jax.random.normal(k, shape, jnp.float32)

    def make_bn(k, ch):
        k1, k2, k3, k4 = jax.random.split(k, 4)
        return (1.0 + 0.1 * jax.random.normal(k1, (ch,), jnp.float32),
                0.1 * jax.random.normal(k2, (ch,), jnp.float32),
                0.1 * jax.random.normal(k3, (ch,), jnp.float32),
                1.0 + 0.1 * jnp.abs(jax.random.normal(k4, (ch,), jnp.float32)))

    decoder_map = jax.random.normal(ks[0], (B, 1, H, W), jnp.float32)
    encoder_map = jax.random.normal(ks[1], (B, C, H, W), jnp.float32)

    params = {
        "dws_dw_w": normal(ks[2], (C, 1, K, K)),
        "dws_bn1": make_bn(ks[3], C),
        "dws_pw_w": normal(ks[4], (C2, C, 1, 1)),
        "dws_bn2": make_bn(ks[5], C2),
        "br_dw_w": [normal(ks[6], (C2, 1, 1, 1), 0.5),
                    normal(ks[7], (C2, 1, K, K)),
                    normal(ks[8], (C2, 1, K, K)),
                    normal(ks[9], (C2, 1, K, K))],
        "br_dw_bn": [make_bn(ks[10 + i], C2) for i in range(4)],
        "br_pw_w": [normal(ks[14 + i], (C8, C2, 1, 1), 0.3) for i in range(4)],
        "br_pw_bn": [make_bn(ks[18 + i], C8) for i in range(4)],
        "c1_w": normal(ks[22], (1, C2, 1, 1), 0.3),
        "c1_bn": make_bn(ks[23], 1),
    }

    packed = prepare_params(params)    # run-once weight folding / packing

    out = jax.block_until_ready(object_attention_pallas(decoder_map, encoder_map, packed))
    ref = jax.block_until_ready(object_attention_reference(decoder_map, encoder_map, params))

    assert out.shape == (B, 1, H, W)
    err = float(jnp.max(jnp.abs(out - ref)))
    assert jnp.allclose(out, ref, atol=5e-4, rtol=5e-4), err

    print("KERNEL_OK")
</pallas_src>

<mosaic_0001>
module attributes {stable_mosaic.version = 11 : i64} {
  func.func @probe(%arg0: memref<8x128xf32, #tpu.memory_space<vmem>>, %arg1: memref<8x128xf32, #tpu.memory_space<vmem>>) attributes {dimension_semantics = [], scalar_prefetch = 0 : i64, scratch_operands = 0 : i64, tpu.core_type = #tpu.core_type<tc>} {
    %c0 = arith.constant 0 : index
    %c0_0 = arith.constant 0 : index
    %0 = vector.load %arg0[%c0, %c0_0] : memref<8x128xf32, #tpu.memory_space<vmem>>, vector<8x128xf32>
    %c1_i32 = arith.constant 1 : i32
    %1 = tpu.dynamic_rotate %0 by %c1_i32 dim 1 : vector<8x128xf32>, i32 -> vector<8x128xf32>
    %c0_1 = arith.constant 0 : index
    %c0_2 = arith.constant 0 : index
    %2 = vector.load %arg1[%c0_1, %c0_2] : memref<8x128xf32, #tpu.memory_space<vmem>>, vector<8x128xf32>
    tpu.vector_store %arg1[%c0_1, %c0_2], %1 {strides = array<i32>} : memref<8x128xf32, #tpu.memory_space<vmem>>, vector<8x128xf32>,
    return
  }
}

</mosaic_0001>

<bundles_post_ra>
// kernel: tpu_custom_call.1
= control target key start
LH: loop header
LB: loop body
LE: loop exit
PB: predicated region body
PF: predicated region fallthrough
CT: control target
= control target key end

     0   :  { %6 = vsyncpa [#allocation3], 0  ;;  %s118_s0 = inlined_call_operand.hbm [shape: f32[8,128], index: 0, kind: input, shape index: {}]   ;;  %s119_s1 = inlined_call_operand.hbm [shape: f32[8,128], index: 1, kind: output, shape index: {}]  }
   0x1   :  { %7 = vsyncpa [#allocation4], 0  ;;  %s13_s8 = sshll.u32 %s118_s0, 4  ;;  %s99_s9 = smov [#allocation2]   ;;  %s14_s8 = int_to_ptr.hbm [resolvable:$true] %s13_s8 }
   0x2   :  { %s15_s10 = sshll.u32 %s99_s9, 4  ;;  %s16_s10 = int_to_ptr.vmem [resolvable:$true] %s15_s10 }
   0x3   :  { %18 = dma.hbm_to_vmem [thread:$0]  %s14_s8, 128, %s16_s10, [#allocation3]  }
   0x4   :  { %95 = dma.done.wait [#allocation3], 128  }
   0x5   :  { %96 = vsyncadd [#allocation3], 4294967168  ;;  %v23_v0 = vld [vmem:[#allocation2] sm:$0xff]  ;;  %s100_s11 = smov 1   ;;  %s101_s12 = smov [#allocation5]  }
   0x6   :  { %24 = vrot.lane.b32.xlu0 %v23_v0, %s100_s11  ;;  %s32_s13 = sshll.u32 %s101_s12, 4  ;;  %s34_s16 = sshll.u32 %s119_s1, 4  ;;  %s33_s13 = int_to_ptr.vmem [resolvable:$true] %s32_s13  ;;  %s35_s16 = int_to_ptr.hbm [resolvable:$true] %s34_s16 }
  0x78   :  { %v25_v1 = vpop.permute.xlu0 %24 }
  0x79   :  { %26 = vst [vmem:[#allocation5] sm:$0xff] %v25_v1 }
  0x7a   :  { %37 = dma.vmem_to_hbm [thread:$0]  %s33_s13, 128, %s35_s16, [#allocation4]  }
  0x7b   :  { %97 = dma.done.wait [#allocation4], 128  }
  0x7c   :  { %98 = vsyncadd [#allocation4], 4294967168 }
  0x7d   :  { %42 = vsyncpa [#allocation3], 1 }
  0x7e   :  { %43 = vsyncpa [#allocation4], 1 }

</bundles_post_ra>
